<compile_context>
chip_gen: v6e
topology: v6e:2x2x1
jax: 0.10.0
libtpu: 0.0.40
codegen_flags: <defaults>
</compile_context>

<pallas_src>
import functools

import jax
import jax.numpy as jnp
from jax.experimental import pallas as pl
from jax.experimental.pallas import tpu as pltpu


def _round_up(x, m):
    return ((x + m - 1) // m) * m


def _mlp_kernel(*refs, num_layers, relu_last, layer_norm, ln_eps,
                compute_dtype):
    # refs layout:
    #   x_ref,
    #   then per layer: w_ref, b_ref [, gamma_ref, beta_ref if layer_norm]
    #   finally: o_ref
    x_ref = refs[0]
    o_ref = refs[-1]
    per_layer = 4 if layer_norm else 2
    param_refs = refs[1:-1]

    h = x_ref[...].astype(compute_dtype)
    for layer in range(num_layers):
        base = layer * per_layer
        w_ref = param_refs[base + 0]
        b_ref = param_refs[base + 1]

        # Narrow MXU operands, f32 accumulation.
        h = jnp.dot(h, w_ref[...], preferred_element_type=jnp.float32)
        h = h + b_ref[...]                        # f32 bias add (VPU)

        if layer_norm:
            g_ref = param_refs[base + 2]
            be_ref = param_refs[base + 3]
            d = h.shape[-1]
            inv_d = 1.0 / d
            s1 = jnp.sum(h, axis=-1, keepdims=True)       # XLU reduction
            s2 = jnp.sum(h * h, axis=-1, keepdims=True)   # XLU reduction
            mean = s1 * inv_d
            var = s2 * inv_d - mean * mean                # single-pass stats
            h = (h - mean) * jax.lax.rsqrt(var + ln_eps)  # rsqrt -> EUP
            h = h * g_ref[...] + be_ref[...]

        is_last = layer == num_layers - 1
        if (not is_last) or relu_last:
            h = jnp.maximum(h, 0.0)
        if not is_last:
            # Feed the next matmul with narrow MXU operands.
            h = h.astype(compute_dtype)

    o_ref[...] = h.astype(o_ref.dtype)


def due_prediction_forward(embed, params, *, relu_last=True, layer_norm=False,
                           ln_eps=1e-5, batch_tile=512,
                           compute_dtype=jnp.bfloat16):
    """Run the DUEPrediction MLP as one fused Pallas kernel.

    embed:  (B, projection_dim) float32
    params: list of dicts per layer with keys 'w' (in,out), 'b' (1,out)
            and optionally 'gamma'/'beta' (1,out) when layer_norm=True.
    """
    B, d_in = embed.shape
    num_layers = len(params)
    widths = [d_in] + [int(p["w"].shape[1]) for p in params]
    d_out = widths[-1]

    # Batch tile: big for MXU utilization, clamped for tiny batches, multiple
    # of 8 sublanes, capped so activations (f32, double-buffered in/out plus
    # the widest intermediate) fit a conservative VMEM activation budget.
    act_budget_bytes = 8 * 1024 * 1024
    max_width = max(widths)
    rows_cap = max(8, act_budget_bytes // max(1, 4 * 4 * max_width))
    tile = max(8, min(_round_up(batch_tile, 8), _round_up(B, 8),
                      _round_up(rows_cap, 8)))
    B_pad = _round_up(B, tile)
    x = embed
    if B_pad != B:
        x = jnp.pad(x, ((0, B_pad - B), (0, 0)))
    grid = (B_pad // tile,)

    in_specs = [pl.BlockSpec((tile, d_in), lambda i: (i, 0))]
    flat_args = [x]
    weight_bytes = 0
    for p in params:
        # Dtype conversions done once here, outside the sequential grid loop.
        w = p["w"].astype(compute_dtype)
        b = p["b"].astype(jnp.float32)
        # Block shape == full array shape -> no (8,128) constraint; constant
        # index_map keeps these resident in VMEM across grid steps.
        in_specs.append(pl.BlockSpec(w.shape, lambda i: (0, 0)))
        flat_args.append(w)
        in_specs.append(pl.BlockSpec(b.shape, lambda i: (0, 0)))
        flat_args.append(b)
        weight_bytes += w.size * w.dtype.itemsize + b.size * b.dtype.itemsize
        if layer_norm:
            g = p["gamma"].astype(jnp.float32)
            be = p["beta"].astype(jnp.float32)
            in_specs.append(pl.BlockSpec(g.shape, lambda i: (0, 0)))
            flat_args.append(g)
            in_specs.append(pl.BlockSpec(be.shape, lambda i: (0, 0)))
            flat_args.append(be)
            weight_bytes += (g.size * g.dtype.itemsize
                             + be.size * be.dtype.itemsize)

    kernel = functools.partial(
        _mlp_kernel,
        num_layers=num_layers,
        relu_last=relu_last,
        layer_norm=layer_norm,
        ln_eps=ln_eps,
        compute_dtype=compute_dtype,
    )

    flops = 2 * B_pad * sum(int(p["w"].shape[0]) * int(p["w"].shape[1])
                            for p in params)
    bytes_accessed = (B_pad * d_in * x.dtype.itemsize
                      + B_pad * d_out * jnp.dtype(embed.dtype).itemsize
                      + weight_bytes)
    cost = pl.CostEstimate(flops=int(flops), transcendentals=0,
                           bytes_accessed=int(bytes_accessed))

    out = pl.pallas_call(
        kernel,
        out_shape=jax.ShapeDtypeStruct((B_pad, d_out), embed.dtype),
        grid=grid,
        in_specs=in_specs,
        out_specs=pl.BlockSpec((tile, d_out), lambda i: (i, 0)),
        compiler_params=pltpu.CompilerParams(
            dimension_semantics=("parallel",)),
        cost_estimate=cost,
    )(*flat_args)

    if B_pad != B:
        out = out[:B]
    return out


def init_due_prediction_params(key, projection_dim, hidden_sizes,
                               path_embedding_dim, layer_norm=False):
    """Deterministic synthetic init matching nn.Linear shapes (transposed)."""
    sizes = [projection_dim] + list(hidden_sizes) + [path_embedding_dim]
    params = []
    for i in range(len(sizes) - 1):
        fan_in, fan_out = sizes[i], sizes[i + 1]
        key, kw, kb = jax.random.split(key, 3)
        bound = 1.0 / jnp.sqrt(fan_in)
        w = jax.random.uniform(kw, (fan_in, fan_out), jnp.float32,
                               minval=-bound, maxval=bound)
        b = jax.random.uniform(kb, (1, fan_out), jnp.float32,
                               minval=-bound, maxval=bound)
        layer = {"w": w, "b": b}
        if layer_norm:
            layer["gamma"] = jnp.ones((1, fan_out), jnp.float32)
            layer["beta"] = jnp.zeros((1, fan_out), jnp.float32)
        params.append(layer)
    return params


def _reference_forward(embed, params, relu_last, layer_norm, ln_eps=1e-5):
    h = embed
    n = len(params)
    for i, p in enumerate(params):
        h = h @ p["w"] + p["b"]
        if layer_norm:
            mean = jnp.mean(h, axis=-1, keepdims=True)
            var = jnp.mean(jnp.square(h - mean), axis=-1, keepdims=True)
            h = (h - mean) * jax.lax.rsqrt(var + ln_eps)
            h = h * p["gamma"] + p["beta"]
        if i < n - 1 or relu_last:
            h = jnp.maximum(h, 0.0)
    return h


if __name__ == "__main__":
    projection_dim = 32
    hidden_sizes = [64, 64]
    path_embedding_dim = 32

    key = jax.random.PRNGKey(0)

    # --- Case 1: default module config, bf16 MXU operands -----------------
    key, k_e1, k_p1 = jax.random.split(key, 3)
    embed1 = jax.random.normal(k_e1, (8, projection_dim), jnp.float32)
    params1 = init_due_prediction_params(
        k_p1, projection_dim, hidden_sizes, path_embedding_dim,
        layer_norm=False)
    out1 = jax.block_until_ready(due_prediction_forward(
        embed1, params1, relu_last=True, layer_norm=False,
        compute_dtype=jnp.bfloat16))
    ref1 = _reference_forward(embed1, params1, True, False)
    assert out1.shape == (8, path_embedding_dim)
    assert jnp.allclose(out1, ref1, atol=5e-2, rtol=5e-2), "case1 mismatch"

    # --- Case 2: batch not divisible by the tile (padding path), f32 -------
    key, k_e2 = jax.random.split(key)
    embed2 = jax.random.normal(k_e2, (12, projection_dim), jnp.float32)
    out2 = jax.block_until_ready(due_prediction_forward(
        embed2, params1, relu_last=True, layer_norm=False,
        batch_tile=8, compute_dtype=jnp.float32))
    ref2 = _reference_forward(embed2, params1, True, False)
    assert out2.shape == (12, path_embedding_dim)
    assert jnp.allclose(out2, ref2, atol=1e-5, rtol=1e-5), "case2 mismatch"

    # --- Case 3: layer_norm=True, relu_last=False, f32 ---------------------
    key, k_e3, k_p3 = jax.random.split(key, 3)
    embed3 = jax.random.normal(k_e3, (8, projection_dim), jnp.float32)
    params3 = init_due_prediction_params(
        k_p3, projection_dim, hidden_sizes, path_embedding_dim,
        layer_norm=True)
    out3 = jax.block_until_ready(due_prediction_forward(
        embed3, params3, relu_last=False, layer_norm=True,
        compute_dtype=jnp.float32))
    ref3 = _reference_forward(embed3, params3, False, True)
    assert out3.shape == (8, path_embedding_dim)
    assert jnp.allclose(out3, ref3, atol=1e-4, rtol=1e-4), "case3 mismatch"

    print("KERNEL_OK")
</pallas_src>

<mosaic_0001>
module attributes {stable_mosaic.version = 11 : i64} {
  func.func @_mlp_kernel(%arg0: i32, %arg1: memref<8x32xf32, #tpu.memory_space<vmem>>, %arg2: memref<32x64xbf16, #tpu.memory_space<vmem>>, %arg3: memref<1x64xf32, #tpu.memory_space<vmem>>, %arg4: memref<64x64xbf16, #tpu.memory_space<vmem>>, %arg5: memref<1x64xf32, #tpu.memory_space<vmem>>, %arg6: memref<64x32xbf16, #tpu.memory_space<vmem>>, %arg7: memref<1x32xf32, #tpu.memory_space<vmem>>, %arg8: memref<8x32xf32, #tpu.memory_space<vmem>>) attributes {dimension_semantics = [#tpu.dimension_semantics<parallel>], iteration_bounds = array<i64: 1>, scalar_prefetch = 0 : i64, scratch_operands = 0 : i64, tpu.core_type = #tpu.core_type<tc>, window_params = [{transform_indices = @transform_0, window_bounds = array<i64: 8, 32>}, {pipeline_mode = #tpu.pipeline_mode<synchronous>, transform_indices = @transform_1, window_bounds = array<i64: 32, 64>}, {pipeline_mode = #tpu.pipeline_mode<synchronous>, transform_indices = @transform_2, window_bounds = array<i64: 1, 64>}, {pipeline_mode = #tpu.pipeline_mode<synchronous>, transform_indices = @transform_3, window_bounds = array<i64: 64, 64>}, {pipeline_mode = #tpu.pipeline_mode<synchronous>, transform_indices = @transform_4, window_bounds = array<i64: 1, 64>}, {pipeline_mode = #tpu.pipeline_mode<synchronous>, transform_indices = @transform_5, window_bounds = array<i64: 64, 32>}, {pipeline_mode = #tpu.pipeline_mode<synchronous>, transform_indices = @transform_6, window_bounds = array<i64: 1, 32>}, {transform_indices = @transform_7, window_bounds = array<i64: 8, 32>}]} {
    %c0 = arith.constant 0 : index
    %c0_0 = arith.constant 0 : index
    %0 = vector.load %arg1[%c0, %c0_0] : memref<8x32xf32, #tpu.memory_space<vmem>>, vector<8x32xf32>
    %1 = arith.truncf %0 : vector<8x32xf32> to vector<8x32xbf16>
    %c0_1 = arith.constant 0 : index
    %c0_2 = arith.constant 0 : index
    %2 = vector.load %arg2[%c0_1, %c0_2] : memref<32x64xbf16, #tpu.memory_space<vmem>>, vector<32x64xbf16>
    %cst = arith.constant dense<0.000000e+00> : vector<8x64xf32>
    %3 = tpu.matmul %1, %2, %cst {dimension_numbers = #tpu.dot_dimension_numbers<[1], [0], [0], [1], [0, 0, 1, 1], [], []>} : vector<8x32xbf16>, vector<32x64xbf16>, vector<8x64xf32> -> vector<8x64xf32>
    %c0_3 = arith.constant 0 : index
    %c0_4 = arith.constant 0 : index
    %4 = vector.load %arg3[%c0_3, %c0_4] : memref<1x64xf32, #tpu.memory_space<vmem>>, vector<1x64xf32>
    %5 = vector.broadcast %4 : vector<1x64xf32> to vector<8x64xf32>
    %6 = arith.addf %3, %5 : vector<8x64xf32>
    %cst_5 = arith.constant 0.000000e+00 : f32
    %7 = vector.broadcast %cst_5 : f32 to vector<8x64xf32>
    %8 = arith.maximumf %6, %7 : vector<8x64xf32>
    %9 = arith.truncf %8 : vector<8x64xf32> to vector<8x64xbf16>
    %c0_6 = arith.constant 0 : index
    %c0_7 = arith.constant 0 : index
    %10 = vector.load %arg4[%c0_6, %c0_7] : memref<64x64xbf16, #tpu.memory_space<vmem>>, vector<64x64xbf16>
    %cst_8 = arith.constant dense<0.000000e+00> : vector<8x64xf32>
    %11 = tpu.matmul %9, %10, %cst_8 {dimension_numbers = #tpu.dot_dimension_numbers<[1], [0], [0], [1], [0, 0, 1, 1], [], []>} : vector<8x64xbf16>, vector<64x64xbf16>, vector<8x64xf32> -> vector<8x64xf32>
    %c0_9 = arith.constant 0 : index
    %c0_10 = arith.constant 0 : index
    %12 = vector.load %arg5[%c0_9, %c0_10] : memref<1x64xf32, #tpu.memory_space<vmem>>, vector<1x64xf32>
    %13 = vector.broadcast %12 : vector<1x64xf32> to vector<8x64xf32>
    %14 = arith.addf %11, %13 : vector<8x64xf32>
    %cst_11 = arith.constant 0.000000e+00 : f32
    %15 = vector.broadcast %cst_11 : f32 to vector<8x64xf32>
    %16 = arith.maximumf %14, %15 : vector<8x64xf32>
    %17 = arith.truncf %16 : vector<8x64xf32> to vector<8x64xbf16>
    %c0_12 = arith.constant 0 : index
    %c0_13 = arith.constant 0 : index
    %18 = vector.load %arg6[%c0_12, %c0_13] : memref<64x32xbf16, #tpu.memory_space<vmem>>, vector<64x32xbf16>
    %cst_14 = arith.constant dense<0.000000e+00> : vector<8x32xf32>
    %19 = tpu.matmul %17, %18, %cst_14 {dimension_numbers = #tpu.dot_dimension_numbers<[1], [0], [0], [1], [0, 0, 1, 1], [], []>} : vector<8x64xbf16>, vector<64x32xbf16>, vector<8x32xf32> -> vector<8x32xf32>
    %c0_15 = arith.constant 0 : index
    %c0_16 = arith.constant 0 : index
    %20 = vector.load %arg7[%c0_15, %c0_16] : memref<1x32xf32, #tpu.memory_space<vmem>>, vector<1x32xf32>
    %21 = vector.broadcast %20 : vector<1x32xf32> to vector<8x32xf32>
    %22 = arith.addf %19, %21 : vector<8x32xf32>
    %cst_17 = arith.constant 0.000000e+00 : f32
    %23 = vector.broadcast %cst_17 : f32 to vector<8x32xf32>
    %24 = arith.maximumf %22, %23 : vector<8x32xf32>
    %c0_18 = arith.constant 0 : index
    %c0_19 = arith.constant 0 : index
    %25 = vector.load %arg8[%c0_18, %c0_19] : memref<8x32xf32, #tpu.memory_space<vmem>>, vector<8x32xf32>
    tpu.vector_store %arg8[%c0_18, %c0_19], %24 {strides = array<i32>} : memref<8x32xf32, #tpu.memory_space<vmem>>, vector<8x32xf32>,
    return
  }
  func.func @transform_0(%arg0: i32) -> (i32, i32) {
    %c0_i32 = arith.constant 0 : i32
    %c0_i32_0 = arith.constant 0 : i32
    return %arg0, %c0_i32 : i32, i32
  }
  func.func @transform_1(%arg0: i32) -> (i32, i32) {
    %c0_i32 = arith.constant 0 : i32
    %c0_i32_0 = arith.constant 0 : i32
    %c0_i32_1 = arith.constant 0 : i32
    return %c0_i32, %c0_i32_0 : i32, i32
  }
  func.func @transform_2(%arg0: i32) -> (i32, i32) {
    %c0_i32 = arith.constant 0 : i32
    %c0_i32_0 = arith.constant 0 : i32
    %c0_i32_1 = arith.constant 0 : i32
    return %c0_i32, %c0_i32_0 : i32, i32
  }
  func.func @transform_3(%arg0: i32) -> (i32, i32) {
    %c0_i32 = arith.constant 0 : i32
    %c0_i32_0 = arith.constant 0 : i32
    %c0_i32_1 = arith.constant 0 : i32
    return %c0_i32, %c0_i32_0 : i32, i32
  }
  func.func @transform_4(%arg0: i32) -> (i32, i32) {
    %c0_i32 = arith.constant 0 : i32
    %c0_i32_0 = arith.constant 0 : i32
    %c0_i32_1 = arith.constant 0 : i32
    return %c0_i32, %c0_i32_0 : i32, i32
  }
  func.func @transform_5(%arg0: i32) -> (i32, i32) {
    %c0_i32 = arith.constant 0 : i32
    %c0_i32_0 = arith.constant 0 : i32
    %c0_i32_1 = arith.constant 0 : i32
    return %c0_i32, %c0_i32_0 : i32, i32
  }
  func.func @transform_6(%arg0: i32) -> (i32, i32) {
    %c0_i32 = arith.constant 0 : i32
    %c0_i32_0 = arith.constant 0 : i32
    %c0_i32_1 = arith.constant 0 : i32
    return %c0_i32, %c0_i32_0 : i32, i32
  }
  func.func @transform_7(%arg0: i32) -> (i32, i32) {
    %c0_i32 = arith.constant 0 : i32
    %c0_i32_0 = arith.constant 0 : i32
    return %arg0, %c0_i32 : i32, i32
  }
}

</mosaic_0001>

<bundles_post_ra>
// kernel: tpu_custom_call.1
= control target key start
LH: loop header
LB: loop body
LE: loop exit
PB: predicated region body
PF: predicated region fallthrough
CT: control target
= control target key end

     0   :  { %12 = vsyncpa [#allocation3], 0  ;;  %s510_s0 = inlined_call_operand.hbm [shape: f32[8,32], index: 0, kind: input, shape index: {}]   ;;  %s511_s1 = inlined_call_operand.vmem [shape: bf16[32,64], index: 1, kind: input, shape index: {}]   ;;  %s512_s2 = inlined_call_operand.vmem [shape: f32[1,64], index: 2, kind: input, shape index: {}]   ;;  %s513_s3 = inlined_call_operand.vmem [shape: bf16[64,64], index: 3, kind: input, shape index: {}]   ;;  %s514_s4 = inlined_call_operand.vmem [shape: f32[1,64], index: 4, kind: input, shape index: {}]   ;;  %s515_s5 = inlined_call_operand.vmem [shape: bf16[64,32], index: 5, kind: input, shape index: {}]   ;;  %s516_s6 = inlined_call_operand.vmem [shape: f32[1,32], index: 6, kind: input, shape index: {}]   ;;  %s517_s7 = inlined_call_operand.hbm [shape: f32[8,32], index: 7, kind: output, shape index: {}]  }
   0x1   :  { %13 = vsyncpa [#allocation4], 0  ;;  %s414_s24 = smov [#allocation2]  }
   0x2   :  { %s20_s25 = sshll.u32 %s414_s24, 4  ;;  %s21_s25 = int_to_ptr.vmem [resolvable:$true] %s20_s25 }
   0x3   :  { %s378_s26 = scalar_lea.vmem %s21_s25, 128  ;;  %p383_p1 = scmp.lt.s32.totalorder %s21_s25, %s21_s25 }
   0x4   :  { %p379_p0 = scmp.ne.s32.totalorder %s21_s25, %s378_s26  ;;  %p384_p2 = scmp.lt.s32.totalorder %s378_s26, %s378_s26 }
   0x6   :  { %p385_p3 = por %p384_p2, %p383_p1 }
   0x8   :  { %p386_p4 = pnand %p385_p3, %p379_p0 }
   0xa   :  { %389 = shalt.err (!%p386_p4)
}
   0xb   :  { %23 = dma.hbm_to_vmem [thread:$0]  %s510_s0, 128, %s21_s25, [#allocation3]  }
   0xc   :  { %410 = dma.done.wait [#allocation3], 128  }
   0xd   :  { %411 = vsyncadd [#allocation3], 4294967168  ;;  %v415_v0 = vmov 0.0   ;;  %vm416_vm0 = vmmov 0   ;;  %v360_v1 = vld [vmem:[%s511_s1 + $0x8] sm:$0xff]   ;;  %v361_v2 = vld [vmem:[%s511_s1] sm:$0xff]  }
   0xe   :  { %324 = vmatprep.subr.bf16.mxu0 %v415_v0  ;;  %328 = vmatprep.mubr.msk.bf16.mxu0 %vm416_vm0, %v415_v0  ;;  %v40_v3 = vld [vmem:[#allocation2] sm:$0xff]  ;;  %v362_v4 = vld [vmem:[%s513_s3 + $0x18] sm:$0xff]   ;;  %vm65_vm1 = vcmask 261120   ;;  %v363_v5 = vld [vmem:[%s513_s3 + $0x10] sm:$0xff]   ;;  %vm150_vm2 = vcmask 523264  }
   0xf   :  { %332 = vmatprep.subr.bf16.mxu1 %v415_v0  ;;  %340 = vmatprep.mubr.msk.bf16.mxu1 %vm416_vm0, %v415_v0  ;;  %v41_v6 = vpack.c.bf16 %v40_v3, %v40_v3  ;;  %v364_v7 = vld [vmem:[%s513_s3 + $0x8] sm:$0xff]   ;;  %v365_v8 = vld [vmem:[%s513_s3] sm:$0xff]   ;;  %v366_v9 = vld [vmem:[%s515_s5 + $0x18] sm:$0xff]  }
  0x10   :  { %325 = vmatpush3.bf16.msra.mxu0 %v360_v1  ;;  %333 = vmatpush3.bf16.msra.mxu1 %v362_v4  ;;  %v367_v10 = vld [vmem:[%s515_s5 + $0x10] sm:$0xff]   ;;  %v295_v11 = vld [vmem:[%s512_s2] ss:$0 sm:$0xff]  ;;  %v368_v19 = vld [vmem:[%s515_s5 + $0x8] sm:$0xff]  }
  0x11   :  { %326 = vmatprep.subr.bf16.mxu0 %v415_v0  ;;  %334 = vmatprep.subr.bf16.mxu1 %v415_v0  ;;  %v369_v20 = vld [vmem:[%s515_s5] sm:$0xff]   ;;  %s417_s5 = smov [#allocation5]  }
  0x12   :  { %v299_v21 = vld [vmem:[%s514_s4] ss:$0 sm:$0xff]  ;;  %s286_s28 = sshll.u32 %s417_s5, 4  ;;  %s287_s28 = int_to_ptr.vmem [resolvable:$true] %s286_s28 }
  0x13   :  { %v305_v29 = vld [vmem:[%s516_s6] ss:$0 sm:$0xff]  ;;  %s390_s4 = scalar_lea.vmem %s287_s28, 128  ;;  %p395_p6 = scmp.lt.s32.totalorder %s287_s28, %s287_s28 }
  0x14   :  { %327 = vmatpush3.bf16.msra.mxu0 %v361_v2  ;;  %335 = vmatpush3.bf16.msra.mxu1 %v363_v5  ;;  %p391_p5 = scmp.ne.s32.totalorder %s287_s28, %s390_s4  ;;  %p396_p7 = scmp.lt.s32.totalorder %s390_s4, %s390_s4 }
  0x15   :  { %344 = vmatprep.subr.bf16.mxu0 %v415_v0  ;;  %336 = vmatprep.subr.bf16.mxu1 %v415_v0 }
  0x16   :  { %p397_p8 = por %p396_p7, %p395_p6 }
  0x17   :  { %329 = vmatmul.mubr.msk.bf16.vlgmr.msra.gmra.mxu0 %vm65_vm1, %v41_v6 }
  0x18   :  { %352 = vmatprep.mubr.msk.bf16.mxu0 %vm416_vm0, %v415_v0  ;;  %337 = vmatpush3.bf16.msra.mxu1 %v364_v7  ;;  %p398_p9 = pnand %p397_p8, %p391_p5 }
  0x19   :  { %338 = vmatprep.subr.bf16.mxu1 %v415_v0  ;;  %345 = vmatpush3.bf16.msra.mxu0 %v366_v9 }
  0x1a   :  { %346 = vmatprep.subr.bf16.mxu0 %v415_v0 }
  0x1c   :  { %339 = vmatpush3.bf16.msra.mxu1 %v365_v8 }
  0x1d   :  { %347 = vmatpush3.bf16.msra.mxu0 %v367_v10 }
  0x1e   :  { %348 = vmatprep.subr.bf16.mxu0 %v415_v0 }
  0x21   :  { %349 = vmatpush3.bf16.msra.mxu0 %v368_v19 }
  0x22   :  { %350 = vmatprep.subr.bf16.mxu0 %v415_v0 }
  0x25   :  { %351 = vmatpush3.bf16.msra.mxu0 %v369_v20 }
  0xd7   :  { %v103_v12 = vpop.f32.mrf.mxu0 }
  0xd8   :  { %v104_v13 = vadd.f32 %v295_v11, %v103_v12 }
  0xd9   :  { %v330_v14 = vpop.f32.mrf.mxu0 }
  0xda   :  { %v109_v15 = vmax.f32 %v104_v13, 0.0 }
  0xdb   :  { %v106_v16 = vpop.f32.mrf.mxu0 }
  0xdc   :  { %v110_v17 = vpack.c.bf16 %v109_v15, %v109_v15 }
  0xdd   :  { %v331_v18 = vpop.f32.mrf.mxu0 }
  0xde   :  { %341 = vmatmul.mubr.msk.bf16.vlgmr.msra.gmra.mxu1 %vm150_vm2, %v110_v17 }
 0x19e   :  { %v188_v22 = vpop.f32.mrf.mxu1 }
 0x19f   :  { %v189_v23 = vadd.f32 %v299_v21, %v188_v22 }
 0x1a0   :  { %v342_v24 = vpop.f32.mrf.mxu1 }
 0x1a1   :  { %v194_v25 = vmax.f32 %v189_v23, 0.0 }
 0x1a2   :  { %v191_v26 = vpop.f32.mrf.mxu1 }
 0x1a3   :  { %v195_v27 = vpack.c.bf16 %v194_v25, %v194_v25 }
 0x1a4   :  { %v343_v28 = vpop.f32.mrf.mxu1 }
 0x1a5   :  { %353 = vmatmul.mubr.msk.bf16.vlgmr.msra.gmra.mxu0 %vm150_vm2, %v195_v27 }
 0x265   :  { %v272_v30 = vpop.f32.mrf.mxu0 }
 0x266   :  { %v273_v31 = vadd.f32 %v305_v29, %v272_v30 }
 0x267   :  { %v354_v32 = vpop.f32.mrf.mxu0 }
 0x268   :  { %v278_v33 = vmax.f32 %v273_v31, 0.0 }
 0x269   :  { %v275_v34 = vpop.f32.mrf.mxu0 }
 0x26a   :  { %279 = vst.msk [vmem:[#allocation5] sm:$0xff] %vm65_vm1, %v278_v33 }
 0x26b   :  { %v355_v35 = vpop.f32.mrf.mxu0 }
 0x26c   :  { %401 = shalt.err (!%p398_p9)
}
 0x26d   :  { %289 = dma.vmem_to_hbm [thread:$0]  %s287_s28, 128, %s517_s7, [#allocation4]  }
 0x26e   :  { %412 = dma.done.wait [#allocation4], 128  }
 0x26f   :  { %413 = vsyncadd [#allocation4], 4294967168 }
 0x270   :  { %293 = vsyncpa [#allocation3], 1 }
 0x271   :  { %294 = vsyncpa [#allocation4], 1 }

</bundles_post_ra>
